<compile_context>
chip_gen: v6e
topology: v6e:2x2x1
jax: 0.10.0
libtpu: 0.0.40
codegen_flags: <defaults>
</compile_context>

<pallas_src>
import functools

import jax
import jax.numpy as jnp
from jax.experimental import pallas as pl
from jax.experimental.pallas import tpu as pltpu

_TARGET_TILE_BYTES = 4 * 1024 * 1024      # ~4 MiB f32 tile per input block
_VMEM_LIMIT_BYTES = 32 * 1024 * 1024      # 2x(in+out) 4 MiB tiles = 16 MiB < 32 MiB
_LANE_CANDIDATES = (1024, 512, 256, 128)  # lane-dense row widths (multiples of 128)
_RAGGED_BLOCK = 512 * 1024                # 2 MiB f32 block for the (1, n) fallback


def _hard_cutoff_kernel(x_ref, o_ref, *, cutoff):
    # Purely elementwise VPU work on the VMEM tile; cast to f32 in-kernel
    # (matches torch promotion against the f32 cutoff buffer).
    x = x_ref[...].astype(jnp.float32)
    mask = jnp.logical_and(x > jnp.float32(0.0), x < jnp.float32(cutoff))
    o_ref[...] = jnp.where(mask, jnp.float32(1.0), jnp.float32(1e-14)).astype(o_ref.dtype)


def _hard_cutoff_call(x2d, cutoff, block_shape, out_dtype):
    rows, cols = x2d.shape
    br, bc = block_shape
    kernel = functools.partial(_hard_cutoff_kernel, cutoff=float(cutoff))
    return pl.pallas_call(
        kernel,
        out_shape=jax.ShapeDtypeStruct((rows, cols), out_dtype),
        grid=(pl.cdiv(rows, br), pl.cdiv(cols, bc)),
        in_specs=[pl.BlockSpec((br, bc), lambda i, j: (i, j))],
        out_specs=pl.BlockSpec((br, bc), lambda i, j: (i, j)),
        compiler_params=pltpu.CompilerParams(
            dimension_semantics=("parallel", "parallel"),
            vmem_limit_bytes=_VMEM_LIMIT_BYTES,
        ),
    )(x2d)


def _pick_lane(n):
    for lane in _LANE_CANDIDATES:
        if n % lane == 0:
            return lane
    return None


def hard_cutoff(x, cutoff=5.0, out_dtype=jnp.float32):
    """HardCutOff elementwise via a Pallas TPU kernel.

    x: any-shaped float array. Returns an array of the same shape.
    out_dtype: defaults to f32 (torch contract); pass x.dtype to cut writeback
    bytes for low-precision inputs.
    """
    orig_shape = x.shape
    n = x.size
    if n == 0:
        return jnp.zeros(orig_shape, out_dtype)

    x_flat = x.reshape(-1)  # bitcast reshape of a contiguous row-major array

    lane = _pick_lane(n)
    if lane is not None:
        # Lane-aligned bulk: (rows, lane) bitcast view, no extra HBM traffic.
        x2d = x_flat.reshape(-1, lane)
        rows = x2d.shape[0]
        if rows <= 8:
            br = rows  # full extent (satisfies the (8,128)/full-dim rule)
        else:
            # Cap block at ~4 MiB f32 and aim for >= 2 grid steps so v7x's two
            # TensorCores both get work on mid-size inputs.
            br_cap = max(8, (_TARGET_TILE_BYTES // (lane * 4)) // 8 * 8)
            half = (rows // 2) // 8 * 8
            br = max(8, min(br_cap, half)) if half >= 8 else 8
        out2d = _hard_cutoff_call(x2d, cutoff, (br, lane), out_dtype)
    else:
        # Ragged n (not a multiple of 128): (1, n) lane-major view; Pallas masks
        # the partial last block, so no slice/concat/pad copies are needed.
        x2d = x_flat.reshape(1, n)
        bc = min(_RAGGED_BLOCK, ((n + 127) // 128) * 128)
        out2d = _hard_cutoff_call(x2d, cutoff, (1, bc), out_dtype)

    return out2d.reshape(orig_shape)


if __name__ == "__main__":
    key = jax.random.PRNGKey(0)
    # Small NCHW-like input; values spread around the cutoff window (0, 5).
    x = jax.random.uniform(
        key, (2, 4, 16, 16), dtype=jnp.float32, minval=-2.0, maxval=8.0
    )

    out = hard_cutoff(x, cutoff=5.0)
    out = jax.block_until_ready(out)

    # Reference check in plain JAX.
    ref = jnp.where(
        jnp.logical_and(x > 0.0, x < 5.0), 1.0, 1e-14
    ).astype(jnp.float32)
    assert out.shape == x.shape
    assert out.dtype == jnp.float32
    assert bool(jnp.allclose(out, ref)), "mismatch vs reference"

    print("KERNEL_OK")
</pallas_src>

<mosaic_0001>
module attributes {stable_mosaic.version = 11 : i64} {
  func.func @_hard_cutoff_kernel(%arg0: i32, %arg1: i32, %arg2: memref<2x1024xf32, #tpu.memory_space<vmem>>, %arg3: memref<2x1024xf32, #tpu.memory_space<vmem>>) attributes {dimension_semantics = [#tpu.dimension_semantics<parallel>, #tpu.dimension_semantics<parallel>], iteration_bounds = array<i64: 1, 1>, scalar_prefetch = 0 : i64, scratch_operands = 0 : i64, tpu.core_type = #tpu.core_type<tc>, window_params = [{transform_indices = @transform_0, window_bounds = array<i64: 2, 1024>}, {transform_indices = @transform_1, window_bounds = array<i64: 2, 1024>}]} {
    %c0 = arith.constant 0 : index
    %c0_0 = arith.constant 0 : index
    %0 = vector.load %arg2[%c0, %c0_0] : memref<2x1024xf32, #tpu.memory_space<vmem>>, vector<2x1024xf32>
    %cst = arith.constant 0.000000e+00 : f32
    %1 = vector.broadcast %cst : f32 to vector<2x1024xf32>
    %2 = arith.cmpf ogt, %0, %1 : vector<2x1024xf32>
    %cst_1 = arith.constant 5.000000e+00 : f32
    %3 = vector.broadcast %cst_1 : f32 to vector<2x1024xf32>
    %4 = arith.cmpf olt, %0, %3 : vector<2x1024xf32>
    %5 = arith.andi %2, %4 : vector<2x1024xi1>
    %cst_2 = arith.constant 1.000000e+00 : f32
    %cst_3 = arith.constant 9.99999982E-15 : f32
    %6 = vector.broadcast %cst_2 : f32 to vector<2x1024xf32>
    %7 = vector.broadcast %cst_3 : f32 to vector<2x1024xf32>
    %8 = arith.select %5, %6, %7 : vector<2x1024xi1>, vector<2x1024xf32>
    %c0_4 = arith.constant 0 : index
    %c0_5 = arith.constant 0 : index
    %9 = vector.load %arg3[%c0_4, %c0_5] : memref<2x1024xf32, #tpu.memory_space<vmem>>, vector<2x1024xf32>
    tpu.vector_store %arg3[%c0_4, %c0_5], %8 {strides = array<i32>} : memref<2x1024xf32, #tpu.memory_space<vmem>>, vector<2x1024xf32>,
    return
  }
  func.func @transform_0(%arg0: i32, %arg1: i32) -> (i32, i32) {
    %c0_i32 = arith.constant 0 : i32
    return %arg0, %arg1 : i32, i32
  }
  func.func @transform_1(%arg0: i32, %arg1: i32) -> (i32, i32) {
    %c0_i32 = arith.constant 0 : i32
    return %arg0, %arg1 : i32, i32
  }
}

</mosaic_0001>

<bundles_post_ra>
// kernel: tpu_custom_call.1
= control target key start
LH: loop header
LB: loop body
LE: loop exit
PB: predicated region body
PF: predicated region fallthrough
CT: control target
= control target key end

     0   :  { %6 = vsyncpa [#allocation3], 0  ;;  %s114_s0 = inlined_call_operand.hbm [shape: f32[2,1024], index: 0, kind: input, shape index: {}]   ;;  %s115_s1 = inlined_call_operand.hbm [shape: f32[2,1024], index: 1, kind: output, shape index: {}]  }
   0x1   :  { %7 = vsyncpa [#allocation4], 0  ;;  %s95_s6 = smov [#allocation2]  }
   0x2   :  { %s14_s7 = sshll.u32 %s95_s6, 4  ;;  %s15_s7 = int_to_ptr.vmem [resolvable:$true] %s14_s7 }
   0x3   :  { %s59_s8 = scalar_lea.vmem %s15_s7, 256  ;;  %p64_p1 = scmp.lt.s32.totalorder %s15_s7, %s15_s7 }
   0x4   :  { %p60_p0 = scmp.ne.s32.totalorder %s15_s7, %s59_s8  ;;  %p65_p2 = scmp.lt.s32.totalorder %s59_s8, %s59_s8 }
   0x6   :  { %p66_p3 = por %p65_p2, %p64_p1 }
   0x8   :  { %p67_p4 = pnand %p66_p3, %p60_p0 }
   0xa   :  { %70 = shalt.err (!%p67_p4)
}
   0xb   :  { %17 = dma.hbm_to_vmem [thread:$0]  %s114_s0, 256, %s15_s7, [#allocation3]  }
   0xc   :  { %91 = dma.done.wait [#allocation3], 256  }
   0xd   :  { %92 = vsyncadd [#allocation3], 4294967040  ;;  %v21_v0 = vld [vmem:[#allocation2] sm:$0xff]  ;;  %v22_v1 = vld [vmem:[#allocation2 + $0x8] sm:$0xff]  ;;  %s96_s11 = smov [#allocation5]  }
   0xe   :  { %s39_s12 = sshll.u32 %s96_s11, 4  ;;  %vm23_vm0 = vcmp.gt.f32.partialorder %v21_v0, 0.0  ;;  %vm25_vm1 = vcmp.lt.f32.partialorder %v21_v0, 5.0  ;;  %vm24_vm2 = vcmp.gt.f32.partialorder %v22_v1, 0.0  ;;  %vm26_vm3 = vcmp.lt.f32.partialorder %v22_v1, 5.0  ;;  %s40_s12 = int_to_ptr.vmem [resolvable:$true] %s39_s12 }
   0xf   :  { %vm27_vm4 = vmand %vm23_vm0, %vm25_vm1  ;;  %v97_v2 = vmov 1e-14   ;;  %s71_s13 = scalar_lea.vmem %s40_s12, 256  ;;  %p76_p6 = scmp.lt.s32.totalorder %s40_s12, %s40_s12 }
  0x10   :  { %v29_v3 = vsel %vm27_vm4, 1.0, %v97_v2  ;;  %vm28_vm5 = vmand %vm24_vm2, %vm26_vm3  ;;  %p72_p5 = scmp.ne.s32.totalorder %s40_s12, %s71_s13  ;;  %p77_p7 = scmp.lt.s32.totalorder %s71_s13, %s71_s13 }
  0x11   :  { %31 = vst [vmem:[#allocation5] sm:$0xff] %v29_v3  ;;  %v30_v4 = vsel %vm28_vm5, 1.0, %v97_v2 }
  0x12   :  { %32 = vst [vmem:[#allocation5 + $0x8] sm:$0xff] %v30_v4  ;;  %p78_p8 = por %p77_p7, %p76_p6 }
  0x14   :  { %p79_p9 = pnand %p78_p8, %p72_p5 }
  0x16   :  { %82 = shalt.err (!%p79_p9)
}
  0x17   :  { %42 = dma.vmem_to_hbm [thread:$0]  %s40_s12, 256, %s115_s1, [#allocation4]  }
  0x18   :  { %93 = dma.done.wait [#allocation4], 256  }
  0x19   :  { %94 = vsyncadd [#allocation4], 4294967040 }
  0x1a   :  { %46 = vsyncpa [#allocation3], 1 }
  0x1b   :  { %47 = vsyncpa [#allocation4], 1 }

</bundles_post_ra>
